<compile_context>
chip_gen: v5e
topology: v5e:2x2
jax: 0.10.0
libtpu: 0.0.40
codegen_flags: <defaults>
</compile_context>

<pallas_src>
import jax
import jax.numpy as jnp
from jax.experimental import pallas as pl
from jax.experimental.pallas import tpu as pltpu

HID1 = 64   # fc1_1 / fc1_2 output width
HID2 = 64   # fc2 output width


def _round_up(x, m):
    return (x + m - 1) // m * m


def _choose_tm(B, tm_max):
    """Batch tile size.

    B <= 256: a single exact tile (block dims == array dims, no masking).
    B  > 256: lane-aligned tile (multiple of 128 -> lane-dense transposed
    output blocks), capped near B/2 so there are >= 2 grid steps and the
    "parallel" axis shards across both v7x TensorCores; last tile is partial
    and masked (no wrapper-side batch padding, waste bounded).
    """
    if B <= 256:
        return B
    return min(_round_up(pl.cdiv(B, 2), 128), tm_max)


def _double_input_kernel(x1_ref, x2_ref, w11_ref, b11_ref, w12_ref, b12_ref,
                         w2a_ref, w2b_ref, b2_ref, wht_ref, bht_ref, out_ref):
    # Inputs arrive f32 straight from HBM; cast to bf16 in-VMEM (MXU operands).
    x1 = x1_ref[...].astype(jnp.bfloat16)
    x2 = x2_ref[...].astype(jnp.bfloat16)

    # Layer 1: fc1_1 / fc1_2 (bf16 MXU, f32 accumulate); bias + ReLU in f32.
    h1 = jnp.dot(x1, w11_ref[...], preferred_element_type=jnp.float32)
    h1 = jnp.maximum(h1 + b11_ref[...], 0.0)
    h2 = jnp.dot(x2, w12_ref[...], preferred_element_type=jnp.float32)
    h2 = jnp.maximum(h2 + b12_ref[...], 0.0)

    # Layer 2: fc2 on the implicit concat [h1 | h2] via split weight halves
    # (no in-kernel concatenate / lane shuffle needed).
    h = jnp.dot(h1.astype(jnp.bfloat16), w2a_ref[...],
                preferred_element_type=jnp.float32)
    h = h + jnp.dot(h2.astype(jnp.bfloat16), w2b_ref[...],
                    preferred_element_type=jnp.float32)
    h = jnp.maximum(h + b2_ref[...], 0.0)

    # Head, computed transposed via A @ B.T:  (out_rows, tm) = Wh^T . h^T.
    # This packs the tiny per-row output densely along lanes -> the writeback
    # slab is outsize*4 B/row instead of 512 B/row.
    # TODO(synk): the module's `activation` ctor arg is an arbitrary Python
    # callable; the kernel implements the default (identity).
    yt = jax.lax.dot_general(
        wht_ref[...], h.astype(jnp.bfloat16),
        dimension_numbers=(((1,), (1,)), ((), ())),
        preferred_element_type=jnp.float32)
    out_ref[...] = (yt + bht_ref[...]).astype(out_ref.dtype)


def double_input_net_forward(firstin, secondin, kparams, *, tm_max=4096):
    """Pallas forward pass of DoubleInputNet (activation = identity)."""
    B, F1 = firstin.shape
    F2 = secondin.shape[1]
    outsize = kparams["outsize"]
    out_rows = kparams["wht"].shape[0]          # outsize rounded up to 8

    tm = _choose_tm(B, tm_max)
    grid = (pl.cdiv(B, tm),)

    # Weights / biases: constant block index -> stay resident in VMEM.
    def _wspec(a):
        return pl.BlockSpec(a.shape, lambda i: (0, 0))

    out_t = pl.pallas_call(
        _double_input_kernel,
        out_shape=jax.ShapeDtypeStruct((out_rows, B), jnp.float32),
        grid=grid,
        in_specs=[
            pl.BlockSpec((tm, F1), lambda i: (i, 0)),   # firstin streams
            pl.BlockSpec((tm, F2), lambda i: (i, 0)),   # secondin streams
            _wspec(kparams["w11"]), _wspec(kparams["b11"]),
            _wspec(kparams["w12"]), _wspec(kparams["b12"]),
            _wspec(kparams["w2a"]), _wspec(kparams["w2b"]), _wspec(kparams["b2"]),
            _wspec(kparams["wht"]), _wspec(kparams["bht"]),
        ],
        # Transposed, lane-dense packed output slab (out_rows, tm).
        out_specs=pl.BlockSpec((out_rows, tm), lambda i: (0, i)),
        compiler_params=pltpu.CompilerParams(
            dimension_semantics=("parallel",)),          # megacore on v7x
    )(firstin, secondin,
      kparams["w11"], kparams["b11"], kparams["w12"], kparams["b12"],
      kparams["w2a"], kparams["w2b"], kparams["b2"],
      kparams["wht"], kparams["bht"])

    # Tiny (out_rows, B) -> (B, outsize) layout fix-up (~64 B/row, off the
    # hot path; the kernel-side writeback is 16x smaller than before).
    return out_t[:outsize].T


def init_params(key, firstinsize, secondinsize, outsize):
    """Deterministic PyTorch-style (uniform +-1/sqrt(fan_in)) init, f32.
    Weights stored pre-transposed as (in_features, out_features)."""
    def linear(key, fan_in, fan_out):
        kw, kb = jax.random.split(key)
        bound = 1.0 / jnp.sqrt(fan_in)
        w = jax.random.uniform(kw, (fan_in, fan_out), jnp.float32, -bound, bound)
        b = jax.random.uniform(kb, (1, fan_out), jnp.float32, -bound, bound)
        return w, b

    k1, k2, k3, k4 = jax.random.split(key, 4)
    w11, b11 = linear(k1, firstinsize, HID1)
    w12, b12 = linear(k2, secondinsize, HID1)
    w2, b2 = linear(k3, 2 * HID1, HID2)          # fc2: 128 -> 64
    wh, bh = linear(k4, HID2, outsize)
    return dict(w11=w11, b11=b11, w12=w12, b12=b12, w2=w2, b2=b2, wh=wh, bh=bh)


def pack_params(p, firstinsize, secondinsize, outsize):
    """Kernel-side parameters:
       - fc2 split into two (64,64) halves (consumes h1/h2 without a concat),
       - head weight/bias stored TRANSPOSED, rows padded to a multiple of 8,
         so the kernel emits a lane-dense (out_rows, batch) packed output,
       - weights bf16 (MXU operands), biases f32 (added on the f32 acc)."""
    out_rows = _round_up(outsize, 8)

    wht = jnp.zeros((out_rows, HID2), jnp.float32).at[:outsize].set(p["wh"].T)
    bht = jnp.zeros((out_rows, 1), jnp.float32).at[:outsize].set(p["bh"].T)

    return dict(
        w11=p["w11"].astype(jnp.bfloat16), b11=p["b11"],
        w12=p["w12"].astype(jnp.bfloat16), b12=p["b12"],
        w2a=p["w2"][:HID1].astype(jnp.bfloat16),
        w2b=p["w2"][HID1:].astype(jnp.bfloat16),
        b2=p["b2"],
        wht=wht.astype(jnp.bfloat16), bht=bht,
        outsize=outsize,
    )


def reference_forward(firstin, secondin, p):
    """Pure-JAX f32 reference matching the PyTorch module."""
    h1 = jnp.maximum(firstin @ p["w11"] + p["b11"], 0.0)
    h2 = jnp.maximum(secondin @ p["w12"] + p["b12"], 0.0)
    h = jnp.concatenate([h1, h2], axis=1)
    h = jnp.maximum(h @ p["w2"] + p["b2"], 0.0)
    return h @ p["wh"] + p["bh"]


if __name__ == "__main__":
    batch = 8
    firstinsize = 16
    secondinsize = 32
    outsize = 8

    key = jax.random.PRNGKey(0)
    kp, kx1, kx2 = jax.random.split(key, 3)

    params = init_params(kp, firstinsize, secondinsize, outsize)
    kparams = pack_params(params, firstinsize, secondinsize, outsize)

    firstin = jax.random.normal(kx1, (batch, firstinsize), jnp.float32)
    secondin = jax.random.normal(kx2, (batch, secondinsize), jnp.float32)

    out = jax.block_until_ready(double_input_net_forward(firstin, secondin, kparams))
    ref = jax.block_until_ready(reference_forward(firstin, secondin, params))

    assert out.shape == (batch, outsize)
    # bf16 matmul operands with f32 accumulation -> loosened tolerance vs f32 ref.
    assert jnp.allclose(out, ref, atol=5e-2, rtol=5e-2), float(
        jnp.max(jnp.abs(out - ref)))

    print("KERNEL_OK")
</pallas_src>

<mosaic_0001>
module attributes {stable_mosaic.version = 11 : i64} {
  func.func @_double_input_kernel(%arg0: i32, %arg1: memref<8x16xf32, #tpu.memory_space<vmem>>, %arg2: memref<8x32xf32, #tpu.memory_space<vmem>>, %arg3: memref<16x64xbf16, #tpu.memory_space<vmem>>, %arg4: memref<1x64xf32, #tpu.memory_space<vmem>>, %arg5: memref<32x64xbf16, #tpu.memory_space<vmem>>, %arg6: memref<1x64xf32, #tpu.memory_space<vmem>>, %arg7: memref<64x64xbf16, #tpu.memory_space<vmem>>, %arg8: memref<64x64xbf16, #tpu.memory_space<vmem>>, %arg9: memref<1x64xf32, #tpu.memory_space<vmem>>, %arg10: memref<8x64xbf16, #tpu.memory_space<vmem>>, %arg11: memref<8x1xf32, #tpu.memory_space<vmem>>, %arg12: memref<8x8xf32, #tpu.memory_space<vmem>>) attributes {dimension_semantics = [#tpu.dimension_semantics<parallel>], iteration_bounds = array<i64: 1>, scalar_prefetch = 0 : i64, scratch_operands = 0 : i64, tpu.core_type = #tpu.core_type<tc>, window_params = [{transform_indices = @transform_0, window_bounds = array<i64: 8, 16>}, {transform_indices = @transform_1, window_bounds = array<i64: 8, 32>}, {pipeline_mode = #tpu.pipeline_mode<synchronous>, transform_indices = @transform_2, window_bounds = array<i64: 16, 64>}, {pipeline_mode = #tpu.pipeline_mode<synchronous>, transform_indices = @transform_3, window_bounds = array<i64: 1, 64>}, {pipeline_mode = #tpu.pipeline_mode<synchronous>, transform_indices = @transform_4, window_bounds = array<i64: 32, 64>}, {pipeline_mode = #tpu.pipeline_mode<synchronous>, transform_indices = @transform_5, window_bounds = array<i64: 1, 64>}, {pipeline_mode = #tpu.pipeline_mode<synchronous>, transform_indices = @transform_6, window_bounds = array<i64: 64, 64>}, {pipeline_mode = #tpu.pipeline_mode<synchronous>, transform_indices = @transform_7, window_bounds = array<i64: 64, 64>}, {pipeline_mode = #tpu.pipeline_mode<synchronous>, transform_indices = @transform_8, window_bounds = array<i64: 1, 64>}, {pipeline_mode = #tpu.pipeline_mode<synchronous>, transform_indices = @transform_9, window_bounds = array<i64: 8, 64>}, {pipeline_mode = #tpu.pipeline_mode<synchronous>, transform_indices = @transform_10, window_bounds = array<i64: 8, 1>}, {transform_indices = @transform_11, window_bounds = array<i64: 8, 8>}]} {
    %c0 = arith.constant 0 : index
    %c0_0 = arith.constant 0 : index
    %0 = vector.load %arg1[%c0, %c0_0] : memref<8x16xf32, #tpu.memory_space<vmem>>, vector<8x16xf32>
    %1 = arith.truncf %0 : vector<8x16xf32> to vector<8x16xbf16>
    %c0_1 = arith.constant 0 : index
    %c0_2 = arith.constant 0 : index
    %2 = vector.load %arg2[%c0_1, %c0_2] : memref<8x32xf32, #tpu.memory_space<vmem>>, vector<8x32xf32>
    %3 = arith.truncf %2 : vector<8x32xf32> to vector<8x32xbf16>
    %c0_3 = arith.constant 0 : index
    %c0_4 = arith.constant 0 : index
    %4 = vector.load %arg3[%c0_3, %c0_4] : memref<16x64xbf16, #tpu.memory_space<vmem>>, vector<16x64xbf16>
    %cst = arith.constant dense<0.000000e+00> : vector<8x64xf32>
    %5 = tpu.matmul %1, %4, %cst {dimension_numbers = #tpu.dot_dimension_numbers<[1], [0], [0], [1], [0, 0, 1, 1], [], []>} : vector<8x16xbf16>, vector<16x64xbf16>, vector<8x64xf32> -> vector<8x64xf32>
    %c0_5 = arith.constant 0 : index
    %c0_6 = arith.constant 0 : index
    %6 = vector.load %arg4[%c0_5, %c0_6] : memref<1x64xf32, #tpu.memory_space<vmem>>, vector<1x64xf32>
    %7 = vector.broadcast %6 : vector<1x64xf32> to vector<8x64xf32>
    %8 = arith.addf %5, %7 : vector<8x64xf32>
    %cst_7 = arith.constant 0.000000e+00 : f32
    %9 = vector.broadcast %cst_7 : f32 to vector<8x64xf32>
    %10 = arith.maximumf %8, %9 : vector<8x64xf32>
    %c0_8 = arith.constant 0 : index
    %c0_9 = arith.constant 0 : index
    %11 = vector.load %arg5[%c0_8, %c0_9] : memref<32x64xbf16, #tpu.memory_space<vmem>>, vector<32x64xbf16>
    %cst_10 = arith.constant dense<0.000000e+00> : vector<8x64xf32>
    %12 = tpu.matmul %3, %11, %cst_10 {dimension_numbers = #tpu.dot_dimension_numbers<[1], [0], [0], [1], [0, 0, 1, 1], [], []>} : vector<8x32xbf16>, vector<32x64xbf16>, vector<8x64xf32> -> vector<8x64xf32>
    %c0_11 = arith.constant 0 : index
    %c0_12 = arith.constant 0 : index
    %13 = vector.load %arg6[%c0_11, %c0_12] : memref<1x64xf32, #tpu.memory_space<vmem>>, vector<1x64xf32>
    %14 = vector.broadcast %13 : vector<1x64xf32> to vector<8x64xf32>
    %15 = arith.addf %12, %14 : vector<8x64xf32>
    %cst_13 = arith.constant 0.000000e+00 : f32
    %16 = vector.broadcast %cst_13 : f32 to vector<8x64xf32>
    %17 = arith.maximumf %15, %16 : vector<8x64xf32>
    %18 = arith.truncf %10 : vector<8x64xf32> to vector<8x64xbf16>
    %c0_14 = arith.constant 0 : index
    %c0_15 = arith.constant 0 : index
    %19 = vector.load %arg7[%c0_14, %c0_15] : memref<64x64xbf16, #tpu.memory_space<vmem>>, vector<64x64xbf16>
    %cst_16 = arith.constant dense<0.000000e+00> : vector<8x64xf32>
    %20 = tpu.matmul %18, %19, %cst_16 {dimension_numbers = #tpu.dot_dimension_numbers<[1], [0], [0], [1], [0, 0, 1, 1], [], []>} : vector<8x64xbf16>, vector<64x64xbf16>, vector<8x64xf32> -> vector<8x64xf32>
    %21 = arith.truncf %17 : vector<8x64xf32> to vector<8x64xbf16>
    %c0_17 = arith.constant 0 : index
    %c0_18 = arith.constant 0 : index
    %22 = vector.load %arg8[%c0_17, %c0_18] : memref<64x64xbf16, #tpu.memory_space<vmem>>, vector<64x64xbf16>
    %cst_19 = arith.constant dense<0.000000e+00> : vector<8x64xf32>
    %23 = tpu.matmul %21, %22, %cst_19 {dimension_numbers = #tpu.dot_dimension_numbers<[1], [0], [0], [1], [0, 0, 1, 1], [], []>} : vector<8x64xbf16>, vector<64x64xbf16>, vector<8x64xf32> -> vector<8x64xf32>
    %24 = arith.addf %20, %23 : vector<8x64xf32>
    %c0_20 = arith.constant 0 : index
    %c0_21 = arith.constant 0 : index
    %25 = vector.load %arg9[%c0_20, %c0_21] : memref<1x64xf32, #tpu.memory_space<vmem>>, vector<1x64xf32>
    %26 = vector.broadcast %25 : vector<1x64xf32> to vector<8x64xf32>
    %27 = arith.addf %24, %26 : vector<8x64xf32>
    %cst_22 = arith.constant 0.000000e+00 : f32
    %28 = vector.broadcast %cst_22 : f32 to vector<8x64xf32>
    %29 = arith.maximumf %27, %28 : vector<8x64xf32>
    %c0_23 = arith.constant 0 : index
    %c0_24 = arith.constant 0 : index
    %30 = vector.load %arg10[%c0_23, %c0_24] : memref<8x64xbf16, #tpu.memory_space<vmem>>, vector<8x64xbf16>
    %31 = arith.truncf %29 : vector<8x64xf32> to vector<8x64xbf16>
    %cst_25 = arith.constant dense<0.000000e+00> : vector<8x8xf32>
    %32 = tpu.matmul %30, %31, %cst_25 {dimension_numbers = #tpu.dot_dimension_numbers<[1], [1], [0], [0], [0, 0, 1, 0], [], []>} : vector<8x64xbf16>, vector<8x64xbf16>, vector<8x8xf32> -> vector<8x8xf32>
    %c0_26 = arith.constant 0 : index
    %c0_27 = arith.constant 0 : index
    %33 = vector.load %arg11[%c0_26, %c0_27] : memref<8x1xf32, #tpu.memory_space<vmem>>, vector<8x1xf32>
    %34 = vector.broadcast %33 : vector<8x1xf32> to vector<8x8xf32>
    %35 = arith.addf %32, %34 : vector<8x8xf32>
    %c0_28 = arith.constant 0 : index
    %c0_29 = arith.constant 0 : index
    %36 = vector.load %arg12[%c0_28, %c0_29] : memref<8x8xf32, #tpu.memory_space<vmem>>, vector<8x8xf32>
    tpu.vector_store %arg12[%c0_28, %c0_29], %35 {strides = array<i32>} : memref<8x8xf32, #tpu.memory_space<vmem>>, vector<8x8xf32>,
    return
  }
  func.func @transform_0(%arg0: i32) -> (i32, i32) {
    %c0_i32 = arith.constant 0 : i32
    %c0_i32_0 = arith.constant 0 : i32
    return %arg0, %c0_i32 : i32, i32
  }
  func.func @transform_1(%arg0: i32) -> (i32, i32) {
    %c0_i32 = arith.constant 0 : i32
    %c0_i32_0 = arith.constant 0 : i32
    return %arg0, %c0_i32 : i32, i32
  }
  func.func @transform_2(%arg0: i32) -> (i32, i32) {
    %c0_i32 = arith.constant 0 : i32
    %c0_i32_0 = arith.constant 0 : i32
    %c0_i32_1 = arith.constant 0 : i32
    return %c0_i32, %c0_i32_0 : i32, i32
  }
  func.func @transform_3(%arg0: i32) -> (i32, i32) {
    %c0_i32 = arith.constant 0 : i32
    %c0_i32_0 = arith.constant 0 : i32
    %c0_i32_1 = arith.constant 0 : i32
    return %c0_i32, %c0_i32_0 : i32, i32
  }
  func.func @transform_4(%arg0: i32) -> (i32, i32) {
    %c0_i32 = arith.constant 0 : i32
    %c0_i32_0 = arith.constant 0 : i32
    %c0_i32_1 = arith.constant 0 : i32
    return %c0_i32, %c0_i32_0 : i32, i32
  }
  func.func @transform_5(%arg0: i32) -> (i32, i32) {
    %c0_i32 = arith.constant 0 : i32
    %c0_i32_0 = arith.constant 0 : i32
    %c0_i32_1 = arith.constant 0 : i32
    return %c0_i32, %c0_i32_0 : i32, i32
  }
  func.func @transform_6(%arg0: i32) -> (i32, i32) {
    %c0_i32 = arith.constant 0 : i32
    %c0_i32_0 = arith.constant 0 : i32
    %c0_i32_1 = arith.constant 0 : i32
    return %c0_i32, %c0_i32_0 : i32, i32
  }
  func.func @transform_7(%arg0: i32) -> (i32, i32) {
    %c0_i32 = arith.constant 0 : i32
    %c0_i32_0 = arith.constant 0 : i32
    %c0_i32_1 = arith.constant 0 : i32
    return %c0_i32, %c0_i32_0 : i32, i32
  }
  func.func @transform_8(%arg0: i32) -> (i32, i32) {
    %c0_i32 = arith.constant 0 : i32
    %c0_i32_0 = arith.constant 0 : i32
    %c0_i32_1 = arith.constant 0 : i32
    return %c0_i32, %c0_i32_0 : i32, i32
  }
  func.func @transform_9(%arg0: i32) -> (i32, i32) {
    %c0_i32 = arith.constant 0 : i32
    %c0_i32_0 = arith.constant 0 : i32
    %c0_i32_1 = arith.constant 0 : i32
    return %c0_i32, %c0_i32_0 : i32, i32
  }
  func.func @transform_10(%arg0: i32) -> (i32, i32) {
    %c0_i32 = arith.constant 0 : i32
    %c0_i32_0 = arith.constant 0 : i32
    %c0_i32_1 = arith.constant 0 : i32
    return %c0_i32, %c0_i32_0 : i32, i32
  }
  func.func @transform_11(%arg0: i32) -> (i32, i32) {
    %c0_i32 = arith.constant 0 : i32
    %c0_i32_0 = arith.constant 0 : i32
    return %c0_i32, %arg0 : i32, i32
  }
}

</mosaic_0001>

<bundles_post_ra>
// kernel: tpu_custom_call.1
= control target key start
LH: loop header
LB: loop body
LE: loop exit
PB: predicated region body
PF: predicated region fallthrough
CT: control target
= control target key end

     0   :  { %16 = vsyncpa [#allocation3], 0  ;;  %s730_s0 = inlined_call_operand.vmem [shape: f32[8,16], index: 0, kind: input, shape index: {}]   ;;  %s731_s1 = inlined_call_operand.hbm [shape: f32[8,32], index: 1, kind: input, shape index: {}]   ;;  %s732_s2 = inlined_call_operand.hbm [shape: bf16[16,64], index: 2, kind: input, shape index: {}]   ;;  %s733_s3 = inlined_call_operand.vmem [shape: f32[1,64], index: 3, kind: input, shape index: {}]   ;;  %s734_s4 = inlined_call_operand.hbm [shape: bf16[32,64], index: 4, kind: input, shape index: {}]   ;;  %s735_s5 = inlined_call_operand.hbm [shape: f32[1,64], index: 5, kind: input, shape index: {}]   ;;  %s736_s6 = inlined_call_operand.hbm [shape: bf16[64,64], index: 6, kind: input, shape index: {}]   ;;  %s737_s7 = inlined_call_operand.hbm [shape: bf16[64,64], index: 7, kind: input, shape index: {}]   ;;  %s738_s8 = inlined_call_operand.vmem [shape: f32[1,64], index: 8, kind: input, shape index: {}]   ;;  %s739_s9 = inlined_call_operand.vmem [shape: bf16[8,64], index: 9, kind: input, shape index: {}]   ;;  %s740_s10 = inlined_call_operand.vmem [shape: f32[8,1], index: 10, kind: input, shape index: {}]   ;;  %s741_s11 = inlined_call_operand.hbm [shape: f32[8,8], index: 11, kind: output, shape index: {}]  }
   0x1   :  { %17 = vsyncpa [#allocation6], 0 }
   0x2   :  { %18 = vsyncpa [#allocation9], 0 }
   0x3   :  { %19 = vsyncpa [#allocation12], 0  ;;  %s38_s19 = sshll.u32 %s732_s2, 4  ;;  %s39_s19 = int_to_ptr.hbm [resolvable:$true] %s38_s19 }
   0x4   :  { %20 = vsyncpa [#allocation4], 0  ;;  %s608_s20 = smov [#allocation5]   ;;  %s67_s24 = sshll.u32 %s735_s5, 4  ;;  %s68_s24 = int_to_ptr.hbm [resolvable:$true] %s67_s24 }
   0x5   :  { %s40_s21 = sshll.u32 %s608_s20, 4  ;;  %s609_s25 = smov 64   ;;  %s41_s21 = int_to_ptr.vmem [resolvable:$true] %s40_s21 }
   0x6   :  { %s610_s26 = smov 4   ;;  %s611_s27 = smov [#allocation8]  }
   0x7   :  { %46 = dma.hbm_to_vmem [thread:$0]  %s39_s19, 128, %s41_s21, [#allocation6], %s609_s25, %s609_s25, %s610_s26  }
   0x8   :  { %s69_s28 = sshll.u32 %s611_s27, 4  ;;  %s28_s30 = sshll.u32 %s731_s1, 4  ;;  %s70_s28 = int_to_ptr.vmem [resolvable:$true] %s69_s28  ;;  %s29_s30 = int_to_ptr.hbm [resolvable:$true] %s28_s30 }
   0x9   :  { %72 = dma.hbm_to_vmem [thread:$0]  %s68_s24, 16, %s70_s28, [#allocation9]  }
   0xa   :  { %s53_s5 = sshll.u32 %s734_s4, 4  ;;  %s612_s14 = smov [#allocation2]   ;;  %s54_s5 = int_to_ptr.hbm [resolvable:$true] %s53_s5 }
   0xb   :  { %s30_s15 = sshll.u32 %s612_s14, 4  ;;  %s613_s16 = smov [#allocation7]   ;;  %s31_s15 = int_to_ptr.vmem [resolvable:$true] %s30_s15 }
   0xc   :  { %33 = dma.hbm_to_vmem [thread:$0]  %s29_s30, 128, %s31_s15, [#allocation3]  }
   0xd   :  { %s55_s17 = sshll.u32 %s613_s16, 4  ;;  %s77_s20 = sshll.u32 %s736_s6, 4  ;;  %s56_s17 = int_to_ptr.vmem [resolvable:$true] %s55_s17  ;;  %s78_s20 = int_to_ptr.hbm [resolvable:$true] %s77_s20 }
   0xe   :  { %61 = dma.hbm_to_vmem [thread:$0]  %s54_s5, 256, %s56_s17, [#allocation6], %s609_s25, %s609_s25, %s610_s26  }
   0xf   :  { %s90_s4 = sshll.u32 %s737_s7, 4  ;;  %s614_s22 = smov [#allocation10]   ;;  %s91_s4 = int_to_ptr.hbm [resolvable:$true] %s90_s4 }
  0x10   :  { %s79_s23 = sshll.u32 %s614_s22, 4  ;;  %s615_s24 = smov [#allocation11]   ;;  %s80_s23 = int_to_ptr.vmem [resolvable:$true] %s79_s23 }
  0x11   :  { %85 = dma.hbm_to_vmem [thread:$0]  %s78_s20, 512, %s80_s23, [#allocation9], %s609_s25, %s609_s25, %s610_s26  }
  0x12   :  { %s92_s6 = sshll.u32 %s615_s24, 4  ;;  %s93_s6 = int_to_ptr.vmem [resolvable:$true] %s92_s6 }
  0x13   :  { %98 = dma.hbm_to_vmem [thread:$0]  %s91_s4, 512, %s93_s6, [#allocation12], %s609_s25, %s609_s25, %s610_s26  }
  0x14   :  { %598 = dma.done.wait [#allocation3], 128  }
  0x15   :  { %599 = vsyncadd [#allocation3], 4294967168 }
  0x16   :  { %600 = dma.done.wait [#allocation6], 384  }
  0x17   :  { %601 = vsyncadd [#allocation6], 4294966912 }
  0x18   :  { %602 = dma.done.wait [#allocation9], 528  }
  0x19   :  { %603 = vsyncadd [#allocation9], 4294966768 }
  0x1a   :  { %604 = dma.done.wait [#allocation12], 512  }
  0x1b   :  { %605 = vsyncadd [#allocation12], 4294966784  ;;  %v405_v0 = vld [vmem:[#allocation5] sm:$0xff]  ;;  %v407_v1 = vld [vmem:[#allocation7 + $0x8] sm:$0xff]  ;;  %vm146_vm0 = vcmask 130048   ;;  %vm184_vm1 = vcmask 261120  }
  0x1c   :  { %v130_v2 = vld [vmem:[%s730_s0] sm:$0xff]  ;;  %v406_v4 = vld [vmem:[#allocation7] sm:$0xff]  ;;  %157 = vmatpush.bf16.msra.mxu0 %v405_v0  ;;  %194 = vmatpush.bf16.msra.mxu1 %v407_v1  ;;  %vm244_vm2 = vcmask 523264   ;;  %v616_v28 = vmov 0   ;;  %s617_s30 = smov [#allocation13]   ;;  %s343_s5 = sshll.u32 %s741_s11, 4  ;;  %s344_s5 = int_to_ptr.hbm [resolvable:$true] %s343_s5 }
  0x1d   :  { %v131_v3 = vpack.c.bf16 %v130_v2, %v130_v2  ;;  %v411_v5 = vld [vmem:[#allocation10 + $0x18] sm:$0xff]  ;;  %v410_v8 = vld [vmem:[#allocation10 + $0x10] sm:$0xff]  ;;  %v409_v11 = vld [vmem:[#allocation10 + $0x8] sm:$0xff]  ;;  %426 = vset.pattern.permute.xlu0 %v616_v28  ;;  %s341_s12 = sshll.u32 %s617_s30, 4  ;;  %vm334_vm3 = vcmask 64512   ;;  %s342_s12 = int_to_ptr.vmem [resolvable:$true] %s341_s12 }
  0x1e   :  { %v132_v6 = vld [vmem:[#allocation2] sm:$0xff]  ;;  %292 = vmatpush.bf16.msra.mxu3 %v411_v5  ;;  %v414_v10 = vld [vmem:[#allocation11 + $0x10] sm:$0xff]  ;;  %v413_v12 = vld [vmem:[#allocation11 + $0x8] sm:$0xff] }
  0x1f   :  { %v415_v7 = vld [vmem:[#allocation11 + $0x18] sm:$0xff]  ;;  %360 = vmatmul.msk.bf16.vlgmr.msra.gmra.mxu0 %vm146_vm0, %v131_v3  ;;  %v133_v9 = vpack.c.bf16 %v132_v6, %v132_v6  ;;  %v408_v13 = vld [vmem:[#allocation10] sm:$0xff] }
  0x20   :  { %252 = vmatpush.bf16.msra.mxu2 %v415_v7  ;;  %195 = vmatpush.bf16.msra.mxu1 %v406_v4  ;;  %v412_v14 = vld [vmem:[#allocation11] sm:$0xff]  ;;  %v427_v15 = vld [vmem:[%s733_s3] ss:$0 sm:$0xff] }
  0x21   :  { %v428_v18 = vld [vmem:[#allocation8] ss:$0 sm:$0xff] }
  0x22   :  { %293 = vmatpush.bf16.msra.mxu3 %v410_v8  ;;  %v309_v27 = vld [vmem:[%s740_s10] sm:$0xff] }
  0x23   :  { %369 = vmatmul.msk.bf16.vlgmr.msra.gmra.mxu1 %vm184_vm1, %v133_v9  ;;  %312 = vperm.xlu0 %426, %v309_v27   ;;  %v429_v30 = vld [vmem:[%s738_s8] ss:$0 sm:$0xff] }
  0x24   :  { %253 = vmatpush.bf16.msra.mxu2 %v414_v10  ;;  %v307_v39 = vld [vmem:[%s739_s9] sm:$0xf] }
  0x26   :  { %294 = vmatpush.bf16.msra.mxu3 %v409_v11 }
  0x28   :  { %254 = vmatpush.bf16.msra.mxu2 %v413_v12 }
  0x2a   :  { %295 = vmatpush.bf16.msra.mxu3 %v408_v13 }
  0x2c   :  { %255 = vmatpush.bf16.msra.mxu2 %v412_v14 }
  0x95   :  { %v313_v40 = vpop.permute.xlu0 %312 }
  0x9c   :  { %v159_v16 = vpop.f32.mrf.mxu0 }
  0x9d   :  { %v160_v17 = vadd.f32 %v427_v15, %v159_v16 }
  0x9f   :  { %v163_v19 = vmax.f32 %v160_v17, 0.0 }
  0xa0   :  { %v197_v20 = vpop.f32.mrf.mxu1 }
  0xa1   :  { %v202_v21 = vpack.c.bf16 %v163_v19, %v163_v19  ;;  %v198_v22 = vadd.f32 %v428_v18, %v197_v20 }
  0xa3   :  { %v201_v23 = vmax.f32 %v198_v22, 0.0  ;;  %403 = vmatmul.msk.bf16.vlgmr.msra.gmra.mxu3 %vm244_vm2, %v202_v21 }
  0xa4   :  { %v161_v24 = vpop.f32.mrf.mxu0 }
  0xa5   :  { %v211_v25 = vpack.c.bf16 %v201_v23, %v201_v23 }
  0xa7   :  { %386 = vmatmul.msk.bf16.vlgmr.msra.gmra.mxu2 %vm244_vm2, %v211_v25 }
  0xa8   :  { %v199_v26 = vpop.f32.mrf.mxu1 }
 0x126   :  { %v297_v29 = vpop.f32.mrf.mxu3 }
 0x12a   :  { %v257_v31 = vpop.f32.mrf.mxu2 }
 0x12b   :  { %v298_v32 = vadd.f32 %v297_v29, %v257_v31 }
 0x12d   :  { %v305_v33 = vadd.f32 %v429_v30, %v298_v32 }
 0x12e   :  { %v299_v34 = vpop.f32.mrf.mxu3 }
 0x12f   :  { %v306_v35 = vmax.f32 %v305_v33, 0.0 }
 0x131   :  { %v308_v36 = vpack.c.bf16 %v306_v35, %v306_v35 }
 0x132   :  { %v259_v37 = vpop.f32.mrf.mxu2 }
 0x133   :  { %v319_v38 = vsel %vm244_vm2, %v308_v36, 0 }
 0x134   :  { %328 = vmatpush.bf16.xpose.msrb.mxu0 %v319_v38 }
 0x13b   :  { %404 = vmatmul.msk.bf16.vlgmr.msrb.gmra.mxu0 %vm244_vm2, %v307_v39 }
 0x1b8   :  { %v330_v41 = vpop.f32.mrf.mxu0 }
 0x1b9   :  { %v331_v42 = vadd.f32 %v330_v41, %v313_v40 }
 0x1bb   :  { %335 = vst.msk [vmem:[#allocation13] sm:$0xff] %vm334_vm3, %v331_v42 }
 0x1bc   :  { %346 = dma.vmem_to_hbm [thread:$0]  %s342_s12, 128, %s344_s5, [#allocation4]  }
 0x1c0   :  { %v332_v43 = vpop.f32.mrf.mxu0 }
 0x1c1   :  { %606 = dma.done.wait [#allocation4], 128  }
 0x1c2   :  { %607 = vsyncadd [#allocation4], 4294967168 }
 0x1c3   :  { %351 = vsyncpa [#allocation3], 1 }
 0x1c4   :  { %352 = vsyncpa [#allocation6], 1 }
 0x1c5   :  { %353 = vsyncpa [#allocation9], 1 }
 0x1c6   :  { %354 = vsyncpa [#allocation12], 1 }
 0x1c7   :  { %355 = vsyncpa [#allocation4], 1 }

</bundles_post_ra>
